<compile_context>
chip_gen: v7x
topology: tpu7x:2x2x1
jax: 0.10.0
libtpu: 0.0.40
codegen_flags: <defaults>
</compile_context>

<pallas_src>
import jax
import jax.numpy as jnp
import numpy as np
from jax.experimental import pallas as pl
from jax.experimental.pallas import tpu as pltpu


# ----------------------------------------------------------------------------
# Kernel 1: per-graph GIN body (first Linear + L GIN layers + sum pooling)
# ----------------------------------------------------------------------------
def _make_gin_body_kernel(L, mm_dtype):
    def mm(a, b):
        # MXU matmul with f32 accumulation.  Weights/adjacency are pre-cast in
        # the wrapper; only the f32 activations are cast here (no-op when f32).
        return jnp.dot(a.astype(mm_dtype), b.astype(mm_dtype),
                       preferred_element_type=jnp.float32)

    def kernel(adj_ref, feat_ref, wf_ref, bf_ref, eps_ref,
               w1_ref, b1_ref, w2_ref, b2_ref,
               embeds_ref, pooled_ref):
        adj = adj_ref[0]                                         # (N, N)

        # ---- the_first_layer over this graph's N node rows ------------------
        x = mm(feat_ref[0], wf_ref[...]) + bf_ref[...]           # (N, D) f32

        # per-layer pooled rows; each is only (1, D) so the live range across
        # the unrolled layer loop is (L+1)*D floats (bounded, no spill risk).
        pools = []

        embeds_ref[0, 0] = x                                     # one (N, D) store
        pools.append(jnp.sum(x, axis=0, keepdims=True))          # XLU sublane reduce

        # ---- GIN layers, fully unrolled; x stays in vregs/VMEM ---------------
        for l in range(L):
            scale = 1.0 + eps_ref[l]                             # SMEM scalar
            agg = mm(adj, x) + scale * x                         # (N, D)
            # GIN MLP (num_slp_layers = 2): Linear -> ReLU -> Linear -> ReLU
            h = jnp.maximum(mm(agg, w1_ref[l]) + b1_ref[l], 0.0)  # (N, H)
            x = jnp.maximum(mm(h, w2_ref[l]) + b2_ref[l], 0.0)    # (N, D)
            embeds_ref[l + 1, 0] = x
            pools.append(jnp.sum(x, axis=0, keepdims=True))

        # ONE lane-dense store of this graph's pooled row (natural layout
        # [pool_0 | pool_1 | ... | pool_L]); the torch .view interleave is a
        # cheap metadata-sized reshape/transpose in the wrapper.
        pooled_ref[0] = jnp.concatenate(pools, axis=-1)          # (1, (L+1)*D)

    return kernel


# ----------------------------------------------------------------------------
# Kernel 2: readout head (lin1 -> ReLU -> lin2 -> softmax), grid-less & tiny
# ----------------------------------------------------------------------------
def _make_head_kernel(mm_dtype):
    def mm(a, b):
        return jnp.dot(a.astype(mm_dtype), b.astype(mm_dtype),
                       preferred_element_type=jnp.float32)

    def kernel(pooled_ref, wl1_ref, bl1_ref, wl2_ref, bl2_ref,
               lin1_ref, lin2_ref, sm_ref):
        pf = pooled_ref[...]                                      # (B, (L+1)*D)
        h1 = jnp.maximum(mm(pf, wl1_ref[...]) + bl1_ref[...], 0.0)
        lin1_ref[...] = h1
        # dropout == identity in eval mode
        z = mm(h1, wl2_ref[...]) + bl2_ref[...]
        lin2_ref[...] = z
        zmax = jnp.max(z, axis=-1, keepdims=True)
        e = jnp.exp(z - zmax)
        denom = jnp.sum(e, axis=-1, keepdims=True)
        sm_ref[...] = e / denom          # exact divide (head is B rows -> free)

    return kernel


# ----------------------------------------------------------------------------
# Wrapper
# ----------------------------------------------------------------------------
def gin_model_forward(adj, feat, params, num_mlp_layers, *, use_bf16=False):
    B, N, Din = feat.shape
    D = params["w_first"].shape[1]
    H = params["w1_all"].shape[2]
    L = num_mlp_layers
    C = params["w_lin2"].shape[1]
    F_cat = (L + 1) * D
    F_mid = params["w_lin1"].shape[1]

    # bf16 MXU operands (exact for the 0/1 adjacency) are valid on v5e too —
    # only elementwise math needs f32, and all elementwise math here is f32.
    mm_dtype = jnp.bfloat16 if use_bf16 else jnp.float32

    # Cast adjacency and weights ONCE in the wrapper (halves their HBM/VMEM
    # footprint in the bf16 path and removes per-layer cast passes in-kernel).
    adj_k = adj.astype(mm_dtype)
    wf = params["w_first"].astype(mm_dtype)
    w1 = params["w1_all"].astype(mm_dtype)
    w2 = params["w2_all"].astype(mm_dtype)
    wl1 = params["w_lin1"].astype(mm_dtype)
    wl2 = params["w_lin2"].astype(mm_dtype)

    gin_kernel = _make_gin_body_kernel(L, mm_dtype)
    head_kernel = _make_head_kernel(mm_dtype)

    smem = pl.BlockSpec(memory_space=pltpu.MemorySpace.SMEM)
    vmem = pl.BlockSpec(memory_space=pltpu.MemorySpace.VMEM)

    # ---- GIN body: grid over graphs, parallel axis (2 TCs on v7x) -----------
    # NOTE(v7x/v5e VMEM): per-step residency is one (N,N) adj tile + one (N,D)
    # feature tile + the stacked weights; no vmem_limit_bytes needed at these
    # sizes, set pltpu.CompilerParams(vmem_limit_bytes=...) once N grows.
    embeds_stacked, pooled_nat = pl.pallas_call(
        gin_kernel,
        grid=(B,),
        in_specs=[
            pl.BlockSpec((1, N, N), lambda b: (b, 0, 0)),         # adj (per graph)
            pl.BlockSpec((1, N, Din), lambda b: (b, 0, 0)),       # features (per graph)
            pl.BlockSpec((Din, D), lambda b: (0, 0)),             # w_first  (resident)
            pl.BlockSpec((1, D), lambda b: (0, 0)),               # b_first  (resident)
            smem,                                                 # eps (SMEM)
            pl.BlockSpec((L, D, H), lambda b: (0, 0, 0)),         # w1_all   (resident)
            pl.BlockSpec((L, 1, H), lambda b: (0, 0, 0)),         # b1_all   (resident)
            pl.BlockSpec((L, H, D), lambda b: (0, 0, 0)),         # w2_all   (resident)
            pl.BlockSpec((L, 1, D), lambda b: (0, 0, 0)),         # b2_all   (resident)
        ],
        out_specs=(
            pl.BlockSpec((L + 1, 1, N, D), lambda b: (0, b, 0, 0)),   # node embeds
            pl.BlockSpec((1, 1, F_cat), lambda b: (b, 0, 0)),         # pooled (natural)
        ),
        out_shape=(
            jax.ShapeDtypeStruct((L + 1, B, N, D), jnp.float32),
            jax.ShapeDtypeStruct((B, 1, F_cat), jnp.float32),
        ),
        compiler_params=pltpu.CompilerParams(
            dimension_semantics=("parallel",)),
    )(adj_k, feat, wf, params["b_first"], params["eps"],
      w1, params["b1_all"], w2, params["b2_all"])

    # Natural layout -> torch layout: stack(pooled) is (L+1, B, D) and is then
    # .view(B, (L+1)*D) (layer/graph interleave).  Tiny metadata-scale ops.
    pooled_nat2d = pooled_nat[:, 0, :]                              # (B, (L+1)*D)
    pooled_lbd = jnp.transpose(pooled_nat2d.reshape(B, L + 1, D), (1, 0, 2))
    pooled_view = pooled_lbd.reshape(B, F_cat)                      # torch .view layout

    # ---- readout head (cannot be fused per-graph: the .view mixes graphs) ---
    lin1_out, lin2_out, softmax_out = pl.pallas_call(
        head_kernel,
        in_specs=[vmem, vmem, vmem, vmem, vmem],
        out_specs=(vmem, vmem, vmem),
        out_shape=(
            jax.ShapeDtypeStruct((B, F_mid), jnp.float32),
            jax.ShapeDtypeStruct((B, C), jnp.float32),
            jax.ShapeDtypeStruct((B, C), jnp.float32),
        ),
    )(pooled_view, wl1, params["b_lin1"], wl2, params["b_lin2"])

    # Reconstruct the torch return signature.
    mlps_output_embeds = [embeds_stacked[l] for l in range(L + 1)]
    mlps_output_embeds_pooled = [pooled_lbd[l] for l in range(L + 1)]
    lin1_dropouted = lin1_out                                       # eval-mode dropout

    return (mlps_output_embeds, embeds_stacked, mlps_output_embeds_pooled,
            pooled_view, lin1_out, lin1_dropouted, lin2_out, softmax_out)


# ----------------------------------------------------------------------------
# Deterministic parameter construction (xavier-normal-like, torch-style init)
# ----------------------------------------------------------------------------
def make_params(key, num_mlp_layers, din, dhid, dout, num_classes):
    def xavier(k, fan_in, fan_out):
        std = float(np.sqrt(2.0 / (fan_in + fan_out)))
        return std * jax.random.normal(k, (fan_in, fan_out), jnp.float32)

    L = num_mlp_layers
    keys = jax.random.split(key, 7 + 2 * L)
    params = {}
    params["w_first"] = xavier(keys[0], din, dout)
    params["b_first"] = 0.1 * jax.random.normal(keys[1], (1, dout), jnp.float32)
    # torch inits eps to zeros; small nonzero values so the eps path is tested.
    params["eps"] = 0.05 * jnp.arange(1, L + 1, dtype=jnp.float32)

    params["w1_all"] = jnp.stack([xavier(keys[2 + 2 * l], dout, dhid) for l in range(L)])
    params["b1_all"] = jnp.zeros((L, 1, dhid), jnp.float32)      # zeroed by initializer
    params["w2_all"] = jnp.stack([xavier(keys[3 + 2 * l], dhid, dout) for l in range(L)])
    params["b2_all"] = jnp.zeros((L, 1, dout), jnp.float32)      # zeroed by initializer

    f_cat = dout * (L + 1)
    f_mid = din * (L + 1)
    params["w_lin1"] = xavier(keys[-4], f_cat, f_mid)
    params["b_lin1"] = 0.1 * jax.random.normal(keys[-3], (1, f_mid), jnp.float32)
    params["w_lin2"] = xavier(keys[-2], f_mid, num_classes)
    params["b_lin2"] = 0.1 * jax.random.normal(keys[-1], (1, num_classes), jnp.float32)
    return params


# ----------------------------------------------------------------------------
# Pure-JAX reference at HIGHEST matmul precision (tight correctness check)
# ----------------------------------------------------------------------------
def reference_forward(adj, feat, params, L):
    prec = jax.lax.Precision.HIGHEST
    x = jnp.matmul(feat, params["w_first"], precision=prec) + params["b_first"]
    embeds = [x]
    pooled = [jnp.sum(x, axis=1)]
    for l in range(L):
        w1, b1 = params["w1_all"][l], params["b1_all"][l]
        w2, b2 = params["w2_all"][l], params["b2_all"][l]
        agg = (jnp.einsum("bij,bjd->bid", adj, x, precision=prec)
               + (1.0 + params["eps"][l]) * x)
        h = jnp.maximum(jnp.matmul(agg, w1, precision=prec) + b1, 0.0)
        x = jnp.maximum(jnp.matmul(h, w2, precision=prec) + b2, 0.0)
        embeds.append(x)
        pooled.append(jnp.sum(x, axis=1))
    B = feat.shape[0]
    D = pooled[0].shape[-1]
    ps = jnp.stack(pooled).reshape(B, (L + 1) * D)
    l1 = jnp.maximum(jnp.matmul(ps, params["w_lin1"], precision=prec)
                     + params["b_lin1"], 0.0)
    l2 = jnp.matmul(l1, params["w_lin2"], precision=prec) + params["b_lin2"]
    sm = jax.nn.softmax(l2, axis=1)
    return jnp.stack(embeds), ps, l1, l2, sm


# ----------------------------------------------------------------------------
if __name__ == "__main__":
    num_mlp_layers = 3
    num_slp_layers = 2           # -> 2 Linear layers inside each GIN MLP
    mlp_input_dim = 16
    mlp_hid_dim = 32
    mlp_output_dim = 16          # must equal mlp_input_dim (module docstring)
    num_classes = 4
    B, N = 4, 8                  # 4 graphs, padded to 8 nodes each
    # NOTE: at real sizes the perf lever is more graphs per call (M = rows),
    # not padding feature dims; these stay toy-sized for the check.

    key = jax.random.PRNGKey(0)
    k_adj, k_feat, k_par = jax.random.split(key, 3)

    adj = jax.random.bernoulli(k_adj, 0.3, (B, N, N)).astype(jnp.float32)
    feat = jax.random.normal(k_feat, (B, N, mlp_input_dim), jnp.float32)
    params = make_params(k_par, num_mlp_layers, mlp_input_dim, mlp_hid_dim,
                         mlp_output_dim, num_classes)

    # --- f32 kernels + tight correctness check -------------------------------
    outs = gin_model_forward(adj, feat, params, num_mlp_layers, use_bf16=False)
    outs = jax.block_until_ready(outs)
    (embeds, embeds_stacked, pooled, pooled_flat,
     lin1_out, lin1_drop, lin2_out, softmax_out) = outs

    assert embeds_stacked.shape == (num_mlp_layers + 1, B, N, mlp_output_dim)
    assert pooled_flat.shape == (B, (num_mlp_layers + 1) * mlp_output_dim)
    assert lin1_out.shape == (B, (num_mlp_layers + 1) * mlp_input_dim)
    assert lin2_out.shape == (B, num_classes)
    assert softmax_out.shape == (B, num_classes)
    assert len(embeds) == num_mlp_layers + 1 and len(pooled) == num_mlp_layers + 1

    emb_ref, ps_ref, l1_ref, l2_ref, sm_ref = reference_forward(
        adj, feat, params, num_mlp_layers)
    np.testing.assert_allclose(np.asarray(embeds_stacked), np.asarray(emb_ref),
                               rtol=1e-4, atol=1e-4)
    np.testing.assert_allclose(np.asarray(pooled_flat), np.asarray(ps_ref),
                               rtol=1e-4, atol=1e-4)
    np.testing.assert_allclose(np.asarray(lin1_out), np.asarray(l1_ref),
                               rtol=1e-4, atol=1e-4)
    np.testing.assert_allclose(np.asarray(lin2_out), np.asarray(l2_ref),
                               rtol=1e-4, atol=1e-4)
    np.testing.assert_allclose(np.asarray(softmax_out), np.asarray(sm_ref),
                               rtol=1e-4, atol=1e-4)

    # --- bf16-MXU-operand variant (valid on v5e/v6e/v7x), ballpark check -----
    outs_bf16 = jax.block_until_ready(
        gin_model_forward(adj, feat, params, num_mlp_layers, use_bf16=True))
    np.testing.assert_allclose(np.asarray(outs_bf16[3]), np.asarray(ps_ref),
                               rtol=1e-1, atol=3e-1)

    print("KERNEL_OK")
</pallas_src>

<mosaic_0001>
module attributes {stable_mosaic.version = 11 : i64} {
  func.func @kernel(%arg0: i32, %arg1: memref<1x8x8xf32, #tpu.memory_space<vmem>>, %arg2: memref<1x8x16xf32, #tpu.memory_space<vmem>>, %arg3: memref<16x16xf32, #tpu.memory_space<vmem>>, %arg4: memref<1x16xf32, #tpu.memory_space<vmem>>, %arg5: memref<3xf32, #tpu.memory_space<smem>>, %arg6: memref<3x16x32xf32, #tpu.memory_space<vmem>>, %arg7: memref<3x1x32xf32, #tpu.memory_space<vmem>>, %arg8: memref<3x32x16xf32, #tpu.memory_space<vmem>>, %arg9: memref<3x1x16xf32, #tpu.memory_space<vmem>>, %arg10: memref<4x1x8x16xf32, #tpu.memory_space<vmem>>, %arg11: memref<1x1x64xf32, #tpu.memory_space<vmem>>) attributes {dimension_semantics = [#tpu.dimension_semantics<parallel>], iteration_bounds = array<i64: 4>, scalar_prefetch = 0 : i64, scratch_operands = 0 : i64, tpu.core_type = #tpu.core_type<tc>, window_params = [{transform_indices = @transform_0, window_bounds = array<i64: 1, 8, 8>}, {transform_indices = @transform_1, window_bounds = array<i64: 1, 8, 16>}, {pipeline_mode = #tpu.pipeline_mode<synchronous>, transform_indices = @transform_2, window_bounds = array<i64: 16, 16>}, {pipeline_mode = #tpu.pipeline_mode<synchronous>, transform_indices = @transform_3, window_bounds = array<i64: 1, 16>}, {transform_indices = @transform_4, window_bounds = array<i64: 3>}, {pipeline_mode = #tpu.pipeline_mode<synchronous>, transform_indices = @transform_5, window_bounds = array<i64: 3, 16, 32>}, {pipeline_mode = #tpu.pipeline_mode<synchronous>, transform_indices = @transform_6, window_bounds = array<i64: 3, 1, 32>}, {pipeline_mode = #tpu.pipeline_mode<synchronous>, transform_indices = @transform_7, window_bounds = array<i64: 3, 32, 16>}, {pipeline_mode = #tpu.pipeline_mode<synchronous>, transform_indices = @transform_8, window_bounds = array<i64: 3, 1, 16>}, {transform_indices = @transform_9, window_bounds = array<i64: 4, 1, 8, 16>}, {transform_indices = @transform_10, window_bounds = array<i64: 1, 1, 64>}]} {
    %c0 = arith.constant 0 : index
    %c0_0 = arith.constant 0 : index
    %c0_1 = arith.constant 0 : index
    %0 = vector.load %arg1[%c0, %c0_0, %c0_1] : memref<1x8x8xf32, #tpu.memory_space<vmem>>, vector<1x8x8xf32>
    %1 = vector.shape_cast %0 : vector<1x8x8xf32> to vector<8x8xf32>
    %c0_2 = arith.constant 0 : index
    %c0_3 = arith.constant 0 : index
    %c0_4 = arith.constant 0 : index
    %2 = vector.load %arg2[%c0_2, %c0_3, %c0_4] : memref<1x8x16xf32, #tpu.memory_space<vmem>>, vector<1x8x16xf32>
    %3 = vector.shape_cast %2 : vector<1x8x16xf32> to vector<8x16xf32>
    %c0_5 = arith.constant 0 : index
    %c0_6 = arith.constant 0 : index
    %4 = vector.load %arg3[%c0_5, %c0_6] : memref<16x16xf32, #tpu.memory_space<vmem>>, vector<16x16xf32>
    %cst = arith.constant dense<0.000000e+00> : vector<8x16xf32>
    %5 = tpu.matmul %3, %4, %cst {dimension_numbers = #tpu.dot_dimension_numbers<[1], [0], [0], [1], [0, 0, 1, 1], [], []>} : vector<8x16xf32>, vector<16x16xf32>, vector<8x16xf32> -> vector<8x16xf32>
    %c0_7 = arith.constant 0 : index
    %c0_8 = arith.constant 0 : index
    %6 = vector.load %arg4[%c0_7, %c0_8] : memref<1x16xf32, #tpu.memory_space<vmem>>, vector<1x16xf32>
    %7 = vector.broadcast %6 : vector<1x16xf32> to vector<8x16xf32>
    %8 = arith.addf %5, %7 : vector<8x16xf32>
    %c0_9 = arith.constant 0 : index
    %c0_10 = arith.constant 0 : index
    %c0_11 = arith.constant 0 : index
    %c0_12 = arith.constant 0 : index
    %9 = vector.load %arg10[%c0_9, %c0_10, %c0_11, %c0_12] : memref<4x1x8x16xf32, #tpu.memory_space<vmem>>, vector<1x1x8x16xf32>
    %10 = vector.shape_cast %9 : vector<1x1x8x16xf32> to vector<8x16xf32>
    %11 = vector.shape_cast %8 : vector<8x16xf32> to vector<1x1x8x16xf32>
    tpu.vector_store %arg10[%c0_9, %c0_10, %c0_11, %c0_12], %11 {strides = array<i32>} : memref<4x1x8x16xf32, #tpu.memory_space<vmem>>, vector<1x1x8x16xf32>,
    %cst_13 = arith.constant dense<0.000000e+00> : vector<16xf32>
    %12 = vector.multi_reduction <add>, %8, %cst_13 [0] : vector<8x16xf32> to vector<16xf32>
    %13 = vector.shape_cast %12 : vector<16xf32> to vector<1x16xf32>
    %c0_14 = arith.constant 0 : index
    %14 = memref.load %arg5[%c0_14] : memref<3xf32, #tpu.memory_space<smem>>
    %cst_15 = arith.constant 1.000000e+00 : f32
    %15 = arith.addf %cst_15, %14 : f32
    %cst_16 = arith.constant dense<0.000000e+00> : vector<8x16xf32>
    %16 = tpu.matmul %1, %8, %cst_16 {dimension_numbers = #tpu.dot_dimension_numbers<[1], [0], [0], [1], [0, 0, 1, 1], [], []>} : vector<8x8xf32>, vector<8x16xf32>, vector<8x16xf32> -> vector<8x16xf32>
    %17 = vector.broadcast %15 : f32 to vector<8x16xf32>
    %18 = arith.mulf %17, %8 : vector<8x16xf32>
    %19 = arith.addf %16, %18 : vector<8x16xf32>
    %c0_17 = arith.constant 0 : index
    %c0_18 = arith.constant 0 : index
    %c0_19 = arith.constant 0 : index
    %20 = vector.load %arg6[%c0_17, %c0_18, %c0_19] : memref<3x16x32xf32, #tpu.memory_space<vmem>>, vector<1x16x32xf32>
    %21 = vector.shape_cast %20 : vector<1x16x32xf32> to vector<16x32xf32>
    %cst_20 = arith.constant dense<0.000000e+00> : vector<8x32xf32>
    %22 = tpu.matmul %19, %21, %cst_20 {dimension_numbers = #tpu.dot_dimension_numbers<[1], [0], [0], [1], [0, 0, 1, 1], [], []>} : vector<8x16xf32>, vector<16x32xf32>, vector<8x32xf32> -> vector<8x32xf32>
    %c0_21 = arith.constant 0 : index
    %c0_22 = arith.constant 0 : index
    %c0_23 = arith.constant 0 : index
    %23 = vector.load %arg7[%c0_21, %c0_22, %c0_23] : memref<3x1x32xf32, #tpu.memory_space<vmem>>, vector<1x1x32xf32>
    %24 = vector.shape_cast %23 : vector<1x1x32xf32> to vector<1x32xf32>
    %25 = vector.broadcast %24 : vector<1x32xf32> to vector<8x32xf32>
    %26 = arith.addf %22, %25 : vector<8x32xf32>
    %cst_24 = arith.constant 0.000000e+00 : f32
    %27 = vector.broadcast %cst_24 : f32 to vector<8x32xf32>
    %28 = arith.maximumf %26, %27 : vector<8x32xf32>
    %c0_25 = arith.constant 0 : index
    %c0_26 = arith.constant 0 : index
    %c0_27 = arith.constant 0 : index
    %29 = vector.load %arg8[%c0_25, %c0_26, %c0_27] : memref<3x32x16xf32, #tpu.memory_space<vmem>>, vector<1x32x16xf32>
    %30 = vector.shape_cast %29 : vector<1x32x16xf32> to vector<32x16xf32>
    %cst_28 = arith.constant dense<0.000000e+00> : vector<8x16xf32>
    %31 = tpu.matmul %28, %30, %cst_28 {dimension_numbers = #tpu.dot_dimension_numbers<[1], [0], [0], [1], [0, 0, 1, 1], [], []>} : vector<8x32xf32>, vector<32x16xf32>, vector<8x16xf32> -> vector<8x16xf32>
    %c0_29 = arith.constant 0 : index
    %c0_30 = arith.constant 0 : index
    %c0_31 = arith.constant 0 : index
    %32 = vector.load %arg9[%c0_29, %c0_30, %c0_31] : memref<3x1x16xf32, #tpu.memory_space<vmem>>, vector<1x1x16xf32>
    %33 = vector.shape_cast %32 : vector<1x1x16xf32> to vector<1x16xf32>
    %34 = vector.broadcast %33 : vector<1x16xf32> to vector<8x16xf32>
    %35 = arith.addf %31, %34 : vector<8x16xf32>
    %cst_32 = arith.constant 0.000000e+00 : f32
    %36 = vector.broadcast %cst_32 : f32 to vector<8x16xf32>
    %37 = arith.maximumf %35, %36 : vector<8x16xf32>
    %c1 = arith.constant 1 : index
    %c0_33 = arith.constant 0 : index
    %c0_34 = arith.constant 0 : index
    %c0_35 = arith.constant 0 : index
    %38 = vector.load %arg10[%c1, %c0_33, %c0_34, %c0_35] : memref<4x1x8x16xf32, #tpu.memory_space<vmem>>, vector<1x1x8x16xf32>
    %39 = vector.shape_cast %38 : vector<1x1x8x16xf32> to vector<8x16xf32>
    %40 = vector.shape_cast %37 : vector<8x16xf32> to vector<1x1x8x16xf32>
    tpu.vector_store %arg10[%c1, %c0_33, %c0_34, %c0_35], %40 {strides = array<i32>} : memref<4x1x8x16xf32, #tpu.memory_space<vmem>>, vector<1x1x8x16xf32>,
    %cst_36 = arith.constant dense<0.000000e+00> : vector<16xf32>
    %41 = vector.multi_reduction <add>, %37, %cst_36 [0] : vector<8x16xf32> to vector<16xf32>
    %42 = vector.shape_cast %41 : vector<16xf32> to vector<1x16xf32>
    %c1_37 = arith.constant 1 : index
    %43 = memref.load %arg5[%c1_37] : memref<3xf32, #tpu.memory_space<smem>>
    %cst_38 = arith.constant 1.000000e+00 : f32
    %44 = arith.addf %cst_38, %43 : f32
    %cst_39 = arith.constant dense<0.000000e+00> : vector<8x16xf32>
    %45 = tpu.matmul %1, %37, %cst_39 {dimension_numbers = #tpu.dot_dimension_numbers<[1], [0], [0], [1], [0, 0, 1, 1], [], []>} : vector<8x8xf32>, vector<8x16xf32>, vector<8x16xf32> -> vector<8x16xf32>
    %46 = vector.broadcast %44 : f32 to vector<8x16xf32>
    %47 = arith.mulf %46, %37 : vector<8x16xf32>
    %48 = arith.addf %45, %47 : vector<8x16xf32>
    %c1_40 = arith.constant 1 : index
    %c0_41 = arith.constant 0 : index
    %c0_42 = arith.constant 0 : index
    %49 = vector.load %arg6[%c1_40, %c0_41, %c0_42] : memref<3x16x32xf32, #tpu.memory_space<vmem>>, vector<1x16x32xf32>
    %50 = vector.shape_cast %49 : vector<1x16x32xf32> to vector<16x32xf32>
    %cst_43 = arith.constant dense<0.000000e+00> : vector<8x32xf32>
    %51 = tpu.matmul %48, %50, %cst_43 {dimension_numbers = #tpu.dot_dimension_numbers<[1], [0], [0], [1], [0, 0, 1, 1], [], []>} : vector<8x16xf32>, vector<16x32xf32>, vector<8x32xf32> -> vector<8x32xf32>
    %c1_44 = arith.constant 1 : index
    %c0_45 = arith.constant 0 : index
    %c0_46 = arith.constant 0 : index
    %52 = vector.load %arg7[%c1_44, %c0_45, %c0_46] : memref<3x1x32xf32, #tpu.memory_space<vmem>>, vector<1x1x32xf32>
    %53 = vector.shape_cast %52 : vector<1x1x32xf32> to vector<1x32xf32>
    %54 = vector.broadcast %53 : vector<1x32xf32> to vector<8x32xf32>
    %55 = arith.addf %51, %54 : vector<8x32xf32>
    %cst_47 = arith.constant 0.000000e+00 : f32
    %56 = vector.broadcast %cst_47 : f32 to vector<8x32xf32>
    %57 = arith.maximumf %55, %56 : vector<8x32xf32>
    %c1_48 = arith.constant 1 : index
    %c0_49 = arith.constant 0 : index
    %c0_50 = arith.constant 0 : index
    %58 = vector.load %arg8[%c1_48, %c0_49, %c0_50] : memref<3x32x16xf32, #tpu.memory_space<vmem>>, vector<1x32x16xf32>
    %59 = vector.shape_cast %58 : vector<1x32x16xf32> to vector<32x16xf32>
    %cst_51 = arith.constant dense<0.000000e+00> : vector<8x16xf32>
    %60 = tpu.matmul %57, %59, %cst_51 {dimension_numbers = #tpu.dot_dimension_numbers<[1], [0], [0], [1], [0, 0, 1, 1], [], []>} : vector<8x32xf32>, vector<32x16xf32>, vector<8x16xf32> -> vector<8x16xf32>
    %c1_52 = arith.constant 1 : index
    %c0_53 = arith.constant 0 : index
    %c0_54 = arith.constant 0 : index
    %61 = vector.load %arg9[%c1_52, %c0_53, %c0_54] : memref<3x1x16xf32, #tpu.memory_space<vmem>>, vector<1x1x16xf32>
    %62 = vector.shape_cast %61 : vector<1x1x16xf32> to vector<1x16xf32>
    %63 = vector.broadcast %62 : vector<1x16xf32> to vector<8x16xf32>
    %64 = arith.addf %60, %63 : vector<8x16xf32>
    %cst_55 = arith.constant 0.000000e+00 : f32
    %65 = vector.broadcast %cst_55 : f32 to vector<8x16xf32>
    %66 = arith.maximumf %64, %65 : vector<8x16xf32>
    %c2 = arith.constant 2 : index
    %c0_56 = arith.constant 0 : index
    %c0_57 = arith.constant 0 : index
    %c0_58 = arith.constant 0 : index
    %67 = vector.load %arg10[%c2, %c0_56, %c0_57, %c0_58] : memref<4x1x8x16xf32, #tpu.memory_space<vmem>>, vector<1x1x8x16xf32>
    %68 = vector.shape_cast %67 : vector<1x1x8x16xf32> to vector<8x16xf32>
    %69 = vector.shape_cast %66 : vector<8x16xf32> to vector<1x1x8x16xf32>
    tpu.vector_store %arg10[%c2, %c0_56, %c0_57, %c0_58], %69 {strides = array<i32>} : memref<4x1x8x16xf32, #tpu.memory_space<vmem>>, vector<1x1x8x16xf32>,
    %cst_59 = arith.constant dense<0.000000e+00> : vector<16xf32>
    %70 = vector.multi_reduction <add>, %66, %cst_59 [0] : vector<8x16xf32> to vector<16xf32>
    %71 = vector.shape_cast %70 : vector<16xf32> to vector<1x16xf32>
    %c2_60 = arith.constant 2 : index
    %72 = memref.load %arg5[%c2_60] : memref<3xf32, #tpu.memory_space<smem>>
    %cst_61 = arith.constant 1.000000e+00 : f32
    %73 = arith.addf %cst_61, %72 : f32
    %cst_62 = arith.constant dense<0.000000e+00> : vector<8x16xf32>
    %74 = tpu.matmul %1, %66, %cst_62 {dimension_numbers = #tpu.dot_dimension_numbers<[1], [0], [0], [1], [0, 0, 1, 1], [], []>} : vector<8x8xf32>, vector<8x16xf32>, vector<8x16xf32> -> vector<8x16xf32>
    %75 = vector.broadcast %73 : f32 to vector<8x16xf32>
    %76 = arith.mulf %75, %66 : vector<8x16xf32>
    %77 = arith.addf %74, %76 : vector<8x16xf32>
    %c2_63 = arith.constant 2 : index
    %c0_64 = arith.constant 0 : index
    %c0_65 = arith.constant 0 : index
    %78 = vector.load %arg6[%c2_63, %c0_64, %c0_65] : memref<3x16x32xf32, #tpu.memory_space<vmem>>, vector<1x16x32xf32>
    %79 = vector.shape_cast %78 : vector<1x16x32xf32> to vector<16x32xf32>
    %cst_66 = arith.constant dense<0.000000e+00> : vector<8x32xf32>
    %80 = tpu.matmul %77, %79, %cst_66 {dimension_numbers = #tpu.dot_dimension_numbers<[1], [0], [0], [1], [0, 0, 1, 1], [], []>} : vector<8x16xf32>, vector<16x32xf32>, vector<8x32xf32> -> vector<8x32xf32>
    %c2_67 = arith.constant 2 : index
    %c0_68 = arith.constant 0 : index
    %c0_69 = arith.constant 0 : index
    %81 = vector.load %arg7[%c2_67, %c0_68, %c0_69] : memref<3x1x32xf32, #tpu.memory_space<vmem>>, vector<1x1x32xf32>
    %82 = vector.shape_cast %81 : vector<1x1x32xf32> to vector<1x32xf32>
    %83 = vector.broadcast %82 : vector<1x32xf32> to vector<8x32xf32>
    %84 = arith.addf %80, %83 : vector<8x32xf32>
    %cst_70 = arith.constant 0.000000e+00 : f32
    %85 = vector.broadcast %cst_70 : f32 to vector<8x32xf32>
    %86 = arith.maximumf %84, %85 : vector<8x32xf32>
    %c2_71 = arith.constant 2 : index
    %c0_72 = arith.constant 0 : index
    %c0_73 = arith.constant 0 : index
    %87 = vector.load %arg8[%c2_71, %c0_72, %c0_73] : memref<3x32x16xf32, #tpu.memory_space<vmem>>, vector<1x32x16xf32>
    %88 = vector.shape_cast %87 : vector<1x32x16xf32> to vector<32x16xf32>
    %cst_74 = arith.constant dense<0.000000e+00> : vector<8x16xf32>
    %89 = tpu.matmul %86, %88, %cst_74 {dimension_numbers = #tpu.dot_dimension_numbers<[1], [0], [0], [1], [0, 0, 1, 1], [], []>} : vector<8x32xf32>, vector<32x16xf32>, vector<8x16xf32> -> vector<8x16xf32>
    %c2_75 = arith.constant 2 : index
    %c0_76 = arith.constant 0 : index
    %c0_77 = arith.constant 0 : index
    %90 = vector.load %arg9[%c2_75, %c0_76, %c0_77] : memref<3x1x16xf32, #tpu.memory_space<vmem>>, vector<1x1x16xf32>
    %91 = vector.shape_cast %90 : vector<1x1x16xf32> to vector<1x16xf32>
    %92 = vector.broadcast %91 : vector<1x16xf32> to vector<8x16xf32>
    %93 = arith.addf %89, %92 : vector<8x16xf32>
    %cst_78 = arith.constant 0.000000e+00 : f32
    %94 = vector.broadcast %cst_78 : f32 to vector<8x16xf32>
    %95 = arith.maximumf %93, %94 : vector<8x16xf32>
    %c3 = arith.constant 3 : index
    %c0_79 = arith.constant 0 : index
    %c0_80 = arith.constant 0 : index
    %c0_81 = arith.constant 0 : index
    %96 = vector.load %arg10[%c3, %c0_79, %c0_80, %c0_81] : memref<4x1x8x16xf32, #tpu.memory_space<vmem>>, vector<1x1x8x16xf32>
    %97 = vector.shape_cast %96 : vector<1x1x8x16xf32> to vector<8x16xf32>
    %98 = vector.shape_cast %95 : vector<8x16xf32> to vector<1x1x8x16xf32>
    tpu.vector_store %arg10[%c3, %c0_79, %c0_80, %c0_81], %98 {strides = array<i32>} : memref<4x1x8x16xf32, #tpu.memory_space<vmem>>, vector<1x1x8x16xf32>,
    %cst_82 = arith.constant dense<0.000000e+00> : vector<16xf32>
    %99 = vector.multi_reduction <add>, %95, %cst_82 [0] : vector<8x16xf32> to vector<16xf32>
    %100 = vector.shape_cast %99 : vector<16xf32> to vector<1x16xf32>
    %101 = tpu.concatenate %13, %42, %71, %100 in 1 : vector<1x16xf32>, vector<1x16xf32>, vector<1x16xf32>, vector<1x16xf32> -> vector<1x64xf32>
    %c0_83 = arith.constant 0 : index
    %c0_84 = arith.constant 0 : index
    %c0_85 = arith.constant 0 : index
    %102 = vector.load %arg11[%c0_83, %c0_84, %c0_85] : memref<1x1x64xf32, #tpu.memory_space<vmem>>, vector<1x1x64xf32>
    %103 = vector.shape_cast %102 : vector<1x1x64xf32> to vector<1x64xf32>
    %104 = vector.shape_cast %101 : vector<1x64xf32> to vector<1x1x64xf32>
    tpu.vector_store %arg11[%c0_83, %c0_84, %c0_85], %104 {strides = array<i32>} : memref<1x1x64xf32, #tpu.memory_space<vmem>>, vector<1x1x64xf32>,
    return
  }
  func.func @transform_0(%arg0: i32) -> (i32, i32, i32) {
    %c0_i32 = arith.constant 0 : i32
    %c0_i32_0 = arith.constant 0 : i32
    %c0_i32_1 = arith.constant 0 : i32
    return %arg0, %c0_i32, %c0_i32_0 : i32, i32, i32
  }
  func.func @transform_1(%arg0: i32) -> (i32, i32, i32) {
    %c0_i32 = arith.constant 0 : i32
    %c0_i32_0 = arith.constant 0 : i32
    %c0_i32_1 = arith.constant 0 : i32
    return %arg0, %c0_i32, %c0_i32_0 : i32, i32, i32
  }
  func.func @transform_2(%arg0: i32) -> (i32, i32) {
    %c0_i32 = arith.constant 0 : i32
    %c0_i32_0 = arith.constant 0 : i32
    %c0_i32_1 = arith.constant 0 : i32
    return %c0_i32, %c0_i32_0 : i32, i32
  }
  func.func @transform_3(%arg0: i32) -> (i32, i32) {
    %c0_i32 = arith.constant 0 : i32
    %c0_i32_0 = arith.constant 0 : i32
    %c0_i32_1 = arith.constant 0 : i32
    return %c0_i32, %c0_i32_0 : i32, i32
  }
  func.func @transform_4(%arg0: i32) -> i32 {
    %c0_i32 = arith.constant 0 : i32
    %c0_i32_0 = arith.constant 0 : i32
    return %c0_i32 : i32
  }
  func.func @transform_5(%arg0: i32) -> (i32, i32, i32) {
    %c0_i32 = arith.constant 0 : i32
    %c0_i32_0 = arith.constant 0 : i32
    %c0_i32_1 = arith.constant 0 : i32
    %c0_i32_2 = arith.constant 0 : i32
    return %c0_i32, %c0_i32_0, %c0_i32_1 : i32, i32, i32
  }
  func.func @transform_6(%arg0: i32) -> (i32, i32, i32) {
    %c0_i32 = arith.constant 0 : i32
    %c0_i32_0 = arith.constant 0 : i32
    %c0_i32_1 = arith.constant 0 : i32
    %c0_i32_2 = arith.constant 0 : i32
    return %c0_i32, %c0_i32_0, %c0_i32_1 : i32, i32, i32
  }
  func.func @transform_7(%arg0: i32) -> (i32, i32, i32) {
    %c0_i32 = arith.constant 0 : i32
    %c0_i32_0 = arith.constant 0 : i32
    %c0_i32_1 = arith.constant 0 : i32
    %c0_i32_2 = arith.constant 0 : i32
    return %c0_i32, %c0_i32_0, %c0_i32_1 : i32, i32, i32
  }
  func.func @transform_8(%arg0: i32) -> (i32, i32, i32) {
    %c0_i32 = arith.constant 0 : i32
    %c0_i32_0 = arith.constant 0 : i32
    %c0_i32_1 = arith.constant 0 : i32
    %c0_i32_2 = arith.constant 0 : i32
    return %c0_i32, %c0_i32_0, %c0_i32_1 : i32, i32, i32
  }
  func.func @transform_9(%arg0: i32) -> (i32, i32, i32, i32) {
    %c0_i32 = arith.constant 0 : i32
    %c0_i32_0 = arith.constant 0 : i32
    %c0_i32_1 = arith.constant 0 : i32
    %c0_i32_2 = arith.constant 0 : i32
    return %c0_i32, %arg0, %c0_i32_0, %c0_i32_1 : i32, i32, i32, i32
  }
  func.func @transform_10(%arg0: i32) -> (i32, i32, i32) {
    %c0_i32 = arith.constant 0 : i32
    %c0_i32_0 = arith.constant 0 : i32
    %c0_i32_1 = arith.constant 0 : i32
    return %arg0, %c0_i32, %c0_i32_0 : i32, i32, i32
  }
}

</mosaic_0001>

<bundles_post_ra>
// kernel: tpu_custom_call.1
= control target key start
LH: loop header
LB: loop body
LE: loop exit
PB: predicated region body
PF: predicated region fallthrough
CT: control target
= control target key end

     0   :  { %s2164_s0 = inlined_call_operand.vmem [shape: f32[4,8,8], index: 0, kind: input, shape index: {}]   ;;  %s2165_s1 = inlined_call_operand.vmem [shape: f32[4,8,16], index: 1, kind: input, shape index: {}]   ;;  %s2166_s2 = inlined_call_operand.vmem [shape: f32[16,16], index: 2, kind: input, shape index: {}]   ;;  %s2167_s3 = inlined_call_operand.vmem [shape: f32[1,16], index: 3, kind: input, shape index: {}]   ;;  %s2168_s4 = inlined_call_operand.vmem [shape: f32[3], index: 4, kind: input, shape index: {}]   ;;  %s2169_s5 = inlined_call_operand.vmem [shape: f32[3,16,32], index: 5, kind: input, shape index: {}]   ;;  %s2170_s6 = inlined_call_operand.vmem [shape: f32[3,1,32], index: 6, kind: input, shape index: {}]   ;;  %s2171_s7 = inlined_call_operand.vmem [shape: f32[3,32,16], index: 7, kind: input, shape index: {}]   ;;  %s2172_s8 = inlined_call_operand.vmem [shape: f32[3,1,16], index: 8, kind: input, shape index: {}]   ;;  %s2173_s9 = inlined_call_operand.hbm [shape: f32[4,4,8,16], index: 9, kind: output, shape index: {0}]   ;;  %s2174_s10 = inlined_call_operand.hbm [shape: f32[4,1,64], index: 10, kind: output, shape index: {1}]  }
   0x1   :  { %2175 = sst [smem:[#allocation11_spill]] %s2164_s0 }
   0x2   :  { %16 = vsyncpa [#allocation4], 0 }
   0x3   :  { %17 = vsyncpa [#allocation3], 0 }
   0x4   :  { %19 = vsyncpa [#allocation3 + $0x1], 0 }
   0x5   :  { %20 = vsyncpa [#allocation7], 0 }
   0x6   :  { %22 = vsyncpa [#allocation7 + $0x1], 0  ;;  %s1854_s13 = smov 0   ;;  %s1856_s14 = smov 0  }
   0x7   :  { %s1858_s15 = smov 0   ;;  %s1860_s16 = smov 0  }
   0x8 LB: > { %s1875_s17 = sadd.s32 4294967295, %s1785_s16   ;;  %s1417_s18 = sadd.s32 4294967294, %s1785_s16   ;;  %s1785_s16 = sphi %s1860_s16, %s2184_s16   ;;  %s1781_s15 = sphi %s1858_s15, %s2183_s15   ;;  %s1777_s14 = sphi %s1856_s14, %s2182_s14   ;;  %s1773_s13 = sphi %s1854_s13, %s2181_s13  }
   0x9   : > { %s1879_s19 = sadd.s32 1, %s1785_s16   ;;  %s234_s20 = sadd.s32 1, %s1781_s15 }
   0xa   : > { %s231_s21 = ssub.s32 %s1785_s16, %s1879_s19  ;;  %p244_p0 = scmp.ne.s32.totalorder %s1781_s15, %s1777_s14 }
   0xb   : > { %p232_p1 = scmp.eq.s32.totalorder %s231_s21, 0  ;;  %p245_p2 = scmp.eq.s32.totalorder %s1875_s17, 3 }
   0xc   : > { %p250_p3 = scmp.ne.s32.totalorder %s1777_s14, %s1773_s13  ;;  %p251_p4 = scmp.eq.s32.totalorder %s1417_s18, 3 }
   0xd   : > { %s1890_s22 = scalar_select %p232_p1, %s1781_s15, %s234_s20  }
   0xe   : > { %p1892_p5 = por %p245_p2, %p244_p0  ;;  %p1896_p6 = por %p251_p4, %p250_p3 }
   0xf   : > { %p1418_p7 = scmp.ge.s32.totalorder %s1785_s16, 1  ;;  %p284_p8 = scmp.lt.s32.totalorder %s1785_s16, 5 }
  0x10   : > { %p1627_p9 = scmp.eq.s32.totalorder %s1875_s17, 0  ;;  %s303_s28 = sshll.u32 %s2168_s4, 4  ;;  %s304_s28 = int_to_ptr.vmem [resolvable:$true] %s303_s28 }
  0x11   : > { %p1903_p10 = pnand %p1418_p7, %p284_p8  ;;  %s1672_s29 = scalar_lea.vmem %s304_s28, 16 }
  0x12   : > { %p1673_p13 = scmp.ne.s32.totalorder %s304_s28, %s1672_s29  ;;  %p1680_p3 = scmp.lt.s32.totalorder %s304_s28, %s304_s28 }
  0x13   : > { %p1616_p11 = pneg %p1903_p10  ;;  %p1681_p4 = scmp.lt.s32.totalorder %s1672_s29, %s1672_s29 }
  0x15   : > { %p1617_p12 = pnand %p1627_p9, %p1616_p11  ;;  %p1682_p7 = por %p1681_p4, %p1680_p3 }
  0x17   : > { %p1674_p0 = pneg %p1617_p12 }
  0x19   : > { %p1675_p1 = pnand %p1674_p0, %p1673_p13 }
  0x1b   : > { %p1676_p2 = pneg %p1675_p1 }
  0x1d   : > { %p1683_p8 = pnand %p1682_p7, %p1676_p2 }
  0x1f   : > { %1686 = shalt.err (!%p1683_p8)
}
  0x20   : > { %s1787_s30 = smov [#allocation2]   ;;  %342 = sbr.rel (%p1903_p10) target bundleno = 2361 (0x939), region = 56 }
  0x21   : > { %1619 = dma.vmem_to_smem (!%p1617_p12), %s304_s28, 16, %s1787_s30, [#allocation4]  }
  0x27   : > { %1760 = dma.done.wait (%p1627_p9), [#allocation4], 16  }
  0x28   : > { %1762 = vsyncadd (%p1627_p9), [#allocation4], 4294967280 }
  0x29   : > { %348 = sfence }
  0x2a   : > { %v398_v0 = vld [vmem:[%s2166_s2] sm:$0xff]  ;;  %v399_v1 = vld [vmem:[%s2166_s2 + $0x8] sm:$0xff]  ;;  %p388_p11 = scmp.lt.s32.totalorder %s1875_s17, 3  ;;  %v1788_v2 = vmov 0.0|0.0   ;;  %vm1789_vm0 = vmmov 0   ;;  %v1790_v4 = vmov 0.0  }
  0x2b   : > { %1578 = vmatprep.subr.bf16.mxu0 %v1788_v2  ;;  %v1579_v3 = vpack.c.bf16 %v399_v1, %v398_v0  ;;  %1506 = vmatprep.mubr.msk.f32.mxu0 %vm1789_vm0, %v1790_v4  ;;  %vm407_vm1 = vcmask 130048   ;;  %s1942_s29 = sand.u32 1, %s1777_s14   ;;  %v1426_v6 = vld [vmem:[%s2167_s3] ss:$0 sm:$0xff]  ;;  %s2179_s0 = sld [smem:[#allocation11_spill]]  ;;  %vm493_vm2 = vcmask 64512  }
  0x2c   : > { %s389_s21 = scalar_select %p388_p11, %s1875_s17, 3  ;;  %1509 = vmatprep.subr.mxu1 %v1790_v4  ;;  %1511 = vmatprep.mubr.msk.f32.mxu1 %vm1789_vm0, %v1790_v4  ;;  %v567_v11 = vld [vmem:[%s2169_s5] sm:$0xff]  ;;  %v568_v12 = vld [vmem:[%s2169_s5 + $0x8] sm:$0xff]  ;;  %v652_v22 = vld [vmem:[%s2171_s7 + $0x10] sm:$0xff]  ;;  %vm661_vm3 = vcmask 261120  }
  0x2d   : > { %1580 = vmatpush3.bf16.msra.mxu0 %v1579_v3  ;;  %s1423_s30 = sshll.u32 %s1942_s29, 5  ;;  %v1582_v13 = vpack.c.bf16 %v568_v12, %v567_v11  ;;  %v650_v14 = vld [vmem:[%s2171_s7] sm:$0xff]  ;;  %v651_v15 = vld [vmem:[%s2171_s7 + $0x8] sm:$0xff]  ;;  %v653_v23 = vld [vmem:[%s2171_s7 + $0x18] sm:$0xff] }
  0x2e   : > { %s1424_s25 = sshll.u32 %s389_s21, 3  ;;  %1584 = vmatprep.subr.bf16.mxu0 %v1788_v2  ;;  %s1955_s26 = scalar_lea.vmem [#allocation5], %s1423_s30  ;;  %v1585_v16 = vpack.c.bf16 %v651_v15, %v650_v14  ;;  %v1588_v24 = vpack.c.bf16 %v653_v23, %v652_v22  ;;  %v1429_v25 = vld [vmem:[%s2170_s6] ss:$0 sm:$0xff]  ;;  %v1436_v42 = vld [vmem:[%s2169_s5 + $0x10] sm:$0xff]  ;;  %v1437_v43 = vld [vmem:[%s2169_s5 + $0x18] sm:$0xff] }
  0x2f   : > { %s395_s28 = scalar_lea.vmem %s2165_s1, %s1424_s25  ;;  %v1431_v30 = vld [vmem:[%s2172_s8] ss:$0 sm:$0xff]  ;;  %v1591_v44 = vpack.c.bf16 %v1437_v43, %v1436_v42  ;;  %v1442_v46 = vld [vmem:[%s2171_s7 + $0x28] sm:$0xff]  ;;  %v1443_v53 = vld [vmem:[%s2171_s7 + $0x30] sm:$0xff]  ;;  %s1465_s30 = sshll.u32 %s1875_s17, 7 }
  0x30   : > { %v397_v5 = vld [vmem:[%s395_s28] sm:$0xff]  ;;  %v1444_v54 = vld [vmem:[%s2171_s7 + $0x38] sm:$0xff]  ;;  %v1457_v15 = vld [vmem:[%s2171_s7 + $0x48] sm:$0xff]  ;;  %s2086_s18 = scalar_lea.hbm %s2173_s9, %s1465_s30 }
  0x31   : > { %1507 = vmatmul.mubr.msk.f32.vlgmr.msra.gmra.mrb[0].mxu0 %vm407_vm1, %v397_v5  ;;  %s391_s21 = scalar_lea.vmem %s2179_s0, %s1424_s25  ;;  %v1441_v45 = vld [vmem:[%s2171_s7 + $0x20] sm:$0xff]  ;;  %v1597_v55 = vpack.c.bf16 %v1444_v54, %v1443_v53  ;;  %v1458_v22 = vld [vmem:[%s2171_s7 + $0x50] sm:$0xff]  ;;  %v1459_v23 = vld [vmem:[%s2171_s7 + $0x58] sm:$0xff] }
  0x32   : > { %1529 = vmatprep.mubr.msk.f32.mxu0 %vm1789_vm0, %v1790_v4  ;;  %v1953_v10 = vld [vmem:[%s391_s21] sm:$0xff]  ;;  %1586 = vmatpush3.bf16.msra.mxu0 %v1585_v16  ;;  %s489_s21 = sld [smem:[#allocation2]]  ;;  %v1594_v47 = vpack.c.bf16 %v1442_v46, %v1441_v45 }
  0x33   : > { %1587 = vmatprep.subr.bf16.mxu0 %v1788_v2  ;;  %v1439_v56 = vld [vmem:[%s2170_s6 + $0x1] ss:$0 sm:$0xff] }
  0x34   : > { %v1446_v61 = vld [vmem:[%s2172_s8 + $0x1] ss:$0 sm:$0xff] }
  0x36   : > { %1589 = vmatpush3.bf16.msra.mxu0 %v1588_v24  ;;  %v1454_v24 = vld [vmem:[%s2170_s6 + $0x2] ss:$0 sm:$0xff] }
  0x37   : > { %1593 = vmatprep.subr.bf16.mxu0 %v1788_v2 }
  0x38   : > { %s490_s25 = sadd.f32 1.0, %s489_s21 }
  0x3a   : > { %v491_v17 = vstv %s490_s25  ;;  %s1791_s25 = smov 16  }
 0x104   : > { %v477_v7 = vpop.f32.mrb[0].mxu0 }
 0x105   : > { %v1951_v8 = vadd.f32 %v1426_v6, %v477_v7  ;;  %v1508_v9 = vpop.f32.mrb[1].mxu0 }
 0x107   : > { %481 = vst.msk [vmem:[%s1955_s26] sm:$0xff] %vm407_vm1, %v1951_v8  ;;  %1510 = vmatpush3.msra.mxu1 %v1951_v8  ;;  %v492_v18 = vmul.f32 %v491_v17, %v1951_v8 }
 0x108   : > { %1512 = vmatmul.mubr.msk.f32.vlgmr.msra.gmra.mrb[0].mxu1 %vm493_vm2, %v1953_v10  ;;  %1581 = vmatprep.subr.bf16.mxu1 %v1788_v2 }
 0x109   : > { %1518 = vmatprep.mubr.msk.f32.mxu1 %vm1789_vm0, %v1790_v4  ;;  %1583 = vmatpush3.bf16.msra.mxu1 %v1582_v13  ;;  %v1451_v13 = vld [vmem:[%s2169_s5 + $0x20] sm:$0xff] }
 0x10a   : > { %1532 = vmatprep.subr.mxu1 %v1790_v4 }
 0x1db   : > { %v563_v19 = vpop.f32.mrb[0].mxu1 }
 0x1dc   : > { %v564_v20 = vadd.f32 %v563_v19, %v492_v18  ;;  %v1513_v21 = vpop.f32.mrb[1].mxu1 }
 0x1de   : > { %1519 = vmatmul.mubr.msk.f32.vlgmr.msra.gmra.mrb[2].mxu1 %vm407_vm1, %v564_v20 }
 0x1df   : > { %1534 = vmatprep.mubr.msk.f32.mxu1 %vm1789_vm0, %v1790_v4 }
 0x2b1   : > { %v645_v26 = vpop.f32.mrb[2].mxu1 }
 0x2b2   : > { %v646_v27 = vadd.f32 %v1429_v25, %v645_v26  ;;  %v1520_v28 = vpop.f32.mrb[3].mxu1 }
 0x2b4   : > { %v649_v29 = vmax.f32 %v646_v27, 0.0 }
 0x2b6   : > { %1530 = vmatmul.mubr.msk.f32.vlgmr.msra.gmra.mrb[2].mxu0 %vm661_vm3, %v649_v29  ;;  %v1461_v29 = vld [vmem:[%s2172_s8 + $0x2] ss:$0 sm:$0xff] }
 0x2b7   : > { %1552 = vmatprep.mubr.msk.f32.mxu0 %vm1789_vm0, %v1790_v4  ;;  %1595 = vmatpush3.bf16.msra.mxu0 %v1594_v47 }
 0x2b8   : > { %1596 = vmatprep.subr.bf16.mxu0 %v1788_v2 }
 0x2bb   : > { %1598 = vmatpush3.bf16.msra.mxu0 %v1597_v55 }
 0x2bc   : > { %1602 = vmatprep.subr.bf16.mxu0 %v1788_v2 }
 0x389   : > { %v731_v31 = vpop.f32.mrb[2].mxu0 }
 0x38a   : > { %v732_v32 = vadd.f32 %v1431_v30, %v731_v31  ;;  %v1531_v33 = vpop.f32.mrb[3].mxu0 }
 0x38c   : > { %v735_v34 = vmax.f32 %v732_v32, 0.0 }
 0x38e   : > { %1433 = vst.msk [vmem:[%s1955_s26 + $0x8] sm:$0xff] %vm407_vm1, %v735_v34  ;;  %1533 = vmatpush3.msra.mxu1 %v735_v34  ;;  %v738_v35 = vsel %vm407_vm1, %v735_v34, 0.0 }
 0x38f   : > { %1535 = vmatmul.mubr.msk.f32.vlgmr.msra.gmra.mrb[4].mxu1 %vm493_vm2, %v1953_v10  ;;  %v739_v36 = vrot.slane %v738_v35, 4  ;;  %1590 = vmatprep.subr.bf16.mxu1 %v1788_v2 }
 0x390   : > { %1541 = vmatprep.mubr.msk.f32.mxu1 %vm1789_vm0, %v1790_v4  ;;  %1592 = vmatpush3.bf16.msra.mxu1 %v1591_v44 }
 0x391   : > { %v740_v37 = vadd.f32 %v739_v36, %v738_v35  ;;  %1555 = vmatprep.subr.mxu1 %v1790_v4 }
 0x393   : > { %v741_v38 = vrot.slane %v740_v37, 2 }
 0x395   : > { %v742_v39 = vadd.f32 %v741_v38, %v740_v37 }
 0x397   : > { %v743_v40 = vrot.slane %v742_v39, 1 }
 0x399   : > { %v744_v41 = vadd.f32 %v743_v40, %v742_v39 }
 0x39b   : > { %1256 = vrot.lane.b32.xlu0 %v744_v41, %s1791_s25  ;;  %s1434_s25 = sld [smem:[#allocation2 + $0x1]] }
 0x3a1   : > { %s746_s27 = sadd.f32 1.0, %s1434_s25  ;;  %s1793_s25 = smov [#allocation5]  }
 0x3a3   : > { %v747_v48 = vstv %s746_s27  ;;  %s1792_s27 = smov 32  }
 0x3a4   : > { %v748_v49 = vmul.f32 %v747_v48, %v735_v34 }
 0x462   : > { %v815_v50 = vpop.f32.mrb[4].mxu1 }
 0x463   : > { %v816_v51 = vadd.f32 %v815_v50, %v748_v49  ;;  %v1536_v52 = vpop.f32.mrb[5].mxu1 }
 0x465   : > { %1542 = vmatmul.mubr.msk.f32.vlgmr.msra.gmra.mrb[6].mxu1 %vm407_vm1, %v816_v51 }
 0x466   : > { %1557 = vmatprep.mubr.msk.f32.mxu1 %vm1789_vm0, %v1790_v4 }
 0x538   : > { %v899_v57 = vpop.f32.mrb[6].mxu1 }
 0x539   : > { %v900_v58 = vadd.f32 %v1439_v56, %v899_v57  ;;  %v1543_v59 = vpop.f32.mrb[7].mxu1 }
 0x53b   : > { %v903_v60 = vmax.f32 %v900_v58, 0.0 }
 0x53d   : > { %1553 = vmatmul.mubr.msk.f32.vlgmr.msra.gmra.mrb[4].mxu0 %vm661_vm3, %v903_v60 }
 0x53e   : > { %1575 = vmatprep.mubr.msk.f32.mxu0 %vm1789_vm0, %v1790_v4 }
 0x610   : > { %v986_v62 = vpop.f32.mrb[4].mxu0 }
 0x611   : > { %v987_v63 = vadd.f32 %v1446_v61, %v986_v62  ;;  %v1554_v0 = vpop.f32.mrb[5].mxu0 }
 0x613   : > { %v990_v1 = vmax.f32 %v987_v63, 0.0 }
 0x615   : > { %1448 = vst.msk [vmem:[%s1955_s26 + $0x10] sm:$0xff] %vm407_vm1, %v990_v1  ;;  %1556 = vmatpush3.msra.mxu1 %v990_v1  ;;  %v993_v3 = vsel %vm407_vm1, %v990_v1, 0.0 }
 0x616   : > { %1558 = vmatmul.mubr.msk.f32.vlgmr.msra.gmra.mrb[8].mxu1 %vm493_vm2, %v1953_v10  ;;  %v994_v5 = vrot.slane %v993_v3, 4  ;;  %1599 = vmatprep.subr.bf16.mxu1 %v1788_v2  ;;  %v1452_v10 = vld [vmem:[%s2169_s5 + $0x28] sm:$0xff] }
 0x617   : > { %1564 = vmatprep.mubr.msk.f32.mxu1 %vm1789_vm0, %v1790_v4  ;;  %v1600_v14 = vpack.c.bf16 %v1452_v10, %v1451_v13  ;;  %v1456_v4 = vld [vmem:[%s2171_s7 + $0x40] sm:$0xff] }
 0x618   : > { %v995_v6 = vadd.f32 %v994_v5, %v993_v3  ;;  %v1603_v16 = vpack.c.bf16 %v1457_v15, %v1456_v4 }
 0x619   : > { %1601 = vmatpush3.bf16.msra.mxu1 %v1600_v14 }
 0x61a   : > { %v996_v7 = vrot.slane %v995_v6, 2  ;;  %1604 = vmatpush3.bf16.msra.mxu0 %v1603_v16 }
 0x61b   : > { %1605 = vmatprep.subr.bf16.mxu0 %v1788_v2  ;;  %v1606_v2 = vpack.c.bf16 %v1459_v23, %v1458_v22 }
 0x61c   : > { %v997_v9 = vadd.f32 %v996_v7, %v995_v6 }
 0x61e   : > { %v998_v11 = vrot.slane %v997_v9, 1  ;;  %1607 = vmatpush3.bf16.msra.mxu0 %v1606_v2 }
 0x620   : > { %v999_v12 = vadd.f32 %v998_v11, %v997_v9 }
 0x622   : > { %1260 = vrot.lane.b32.xlu0 %v999_v12, %s1792_s27  ;;  %s1449_s27 = sld [smem:[#allocation2 + $0x2]] }
 0x628   : > { %s1001_s28 = sadd.f32 1.0, %s1449_s27  ;;  %s1691_s27 = sshll.u32 %s1793_s25, 4  ;;  %s1692_s27 = int_to_ptr.vmem [resolvable:$false] %s1691_s27 }
 0x62a   : > { %v1002_v17 = vstv %s1001_s28  ;;  %s1290_s28 = sshll.u32 %s1955_s26, 4  ;;  %s2077_s28 = int_to_ptr.vmem [resolvable:$true] %s1290_s28 }
 0x62b   : > { %v1003_v18 = vmul.f32 %v1002_v17, %v990_v1  ;;  %s1687_s21 = scalar_lea.vmem %s2077_s28, 512  ;;  %p1694_p13 = scmp.lt.s32.totalorder %s2077_s28, %s1692_s27 }
 0x62c   : > { %p1688_p9 = scmp.ne.s32.totalorder %s2077_s28, %s1687_s21 }
 0x62e   : > { %p1689_p10 = pnand %p1688_p9, %p1892_p5 }
 0x630   : > { %p1690_p12 = pneg %p1689_p10 }
 0x6e9   : > { %v1070_v19 = vpop.f32.mrb[8].mxu1 }
 0x6ea   : > { %v1071_v20 = vadd.f32 %v1070_v19, %v1003_v18  ;;  %v1559_v21 = vpop.f32.mrb[9].mxu1 }
 0x6ec   : > { %1565 = vmatmul.mubr.msk.f32.vlgmr.msra.gmra.mrb[10].mxu1 %vm407_vm1, %v1071_v20 }
 0x7bf   : > { %v1154_v25 = vpop.f32.mrb[10].mxu1 }
 0x7c0   : > { %v1155_v26 = vadd.f32 %v1454_v24, %v1154_v25  ;;  %v1566_v27 = vpop.f32.mrb[11].mxu1 }
 0x7c2   : > { %v1158_v28 = vmax.f32 %v1155_v26, 0.0 }
 0x7c4   : > { %1576 = vmatmul.mubr.msk.f32.vlgmr.msra.gmra.mrb[6].mxu0 %vm661_vm3, %v1158_v28 }
 0x897   : > { %v1241_v30 = vpop.f32.mrb[6].mxu0 }
 0x898   : > { %v1242_v31 = vadd.f32 %v1461_v29, %v1241_v30  ;;  %v1577_v32 = vpop.f32.mrb[7].mxu0 }
 0x89a   : > { %v1245_v33 = vmax.f32 %v1242_v31, 0.0 }
 0x89c   : > { %1463 = vst.msk [vmem:[%s1955_s26 + $0x18] sm:$0xff] %vm407_vm1, %v1245_v33  ;;  %v1248_v34 = vsel %vm407_vm1, %v1245_v33, 0.0  ;;  %s1693_s26 = scalar_lea.vmem %s1692_s27, 1024 }
 0x89d   : > { %v1249_v35 = vrot.slane %v1248_v34, 4  ;;  %p1695_p0 = scmp.lt.s32.totalorder %s1693_s26, %s1687_s21 }
 0x89f   : > { %v1250_v36 = vadd.f32 %v1249_v35, %v1248_v34  ;;  %p1696_p1 = por %p1695_p0, %p1694_p13 }
 0x8a1   : > { %p1697_p2 = pnand %p1696_p1, %p1690_p12 }
 0x8a3   : > { %1700 = shalt.err (!%p1697_p2)
}
 0x8a4   : > { %s1701_s30 = scalar_lea.hbm %s2086_s18, 512  ;;  %s1705_s25 = scalar_lea.hbm %s2173_s9, 2048 }
 0x8a5   : > { %p1702_p3 = scmp.ne.s32.totalorder %s2086_s18, %s1701_s30  ;;  %p1706_p8 = scmp.lt.u32.totalorder %s2086_s18, %s2173_s9 }
 0x8a6   : > { %p1707_p11 = scmp.lt.u32.totalorder %s1705_s25, %s1701_s30  ;;  %p1709_p10 = scmp.lt.u32.totalorder %s1701_s30, %s2086_s18 }
 0x8a7   : > { %p1703_p4 = pnand %p1702_p3, %p1892_p5 }
 0x8a8   : > { %p1708_p9 = por %p1707_p11, %p1706_p8 }
 0x8a9   : > { %p1704_p7 = pneg %p1703_p4 }
 0x8aa   : > { %p1710_p12 = por %p1709_p10, %p1708_p9 }
 0x8ac   : > { %p1711_p13 = pnand %p1710_p12, %p1704_p7 }
 0x8ae   : > { %1714 = shalt.err (!%p1711_p13)
}
 0x8af   : > { %s1794_s21 = smov 128   ;;  %s1795_s26 = smov 512   ;;  %v1251_v37 = vrot.slane %v1250_v36, 2  ;;  %v482_v41 = vsel %vm407_vm1, %v1951_v8, 0.0  ;;  %v1257_v47 = vpop.permute.xlu0 %1256  ;;  %vm1269_vm4 = vcmask 392192   ;;  %vm1271_vm5 = vcmask 516096  }
 0x8b0   : > { %s1796_s0 = smov 8   ;;  %s2180_s11 = scalar_lea.sflag [#allocation3], %s1942_s29  ;;  %v483_v42 = vrot.slane %v482_v41, 4 }
 0x8b1   : > { %1612 = dma.vmem_to_hbm [thread:$0]  (%p1892_p5), %s2077_s28, 512, %s2086_s18, %s2180_s11, %s1794_s21, %s1795_s26, %s1796_s0   ;;  %v1252_v38 = vadd.f32 %v1251_v37, %v1250_v36 }
 0x8b2   : > { %s1797_s20 = smov 48   ;;  %v484_v43 = vadd.f32 %v483_v42, %v482_v41  ;;  %s1466_s0 = sshll.u32 %s1875_s17, 4 }
 0x8b3   : > { %v1253_v39 = vrot.slane %v1252_v38, 1  ;;  %v1261_v49 = vpop.permute.xlu0 %1260  ;;  %s387_s28 = scalar_lea.vmem [#allocation6], %s1942_s29  ;;  %s2121_s25 = scalar_lea.hbm %s2174_s10, %s1466_s0 }
 0x8b4   : > { %v485_v44 = vrot.slane %v484_v43, 2  ;;  %s1306_s18 = sshll.u32 %s387_s28, 4  ;;  %s1279_s17 = scalar_lea.sflag [#allocation7], %s1942_s29  ;;  %s2123_s18 = int_to_ptr.vmem [resolvable:$true] %s1306_s18 }
 0x8b5   : > { %v1254_v40 = vadd.f32 %v1253_v39, %v1252_v38  ;;  %s1715_s27 = scalar_lea.vmem %s2123_s18, 16  ;;  %s1798_s21 = smov [#allocation6]  }
 0x8b6   : > { %v486_v45 = vadd.f32 %v485_v44, %v484_v43  ;;  %p1716_p0 = scmp.ne.s32.totalorder %s2123_s18, %s1715_s27  ;;  %s1719_s26 = sshll.u32 %s1798_s21, 4  ;;  %s1720_s26 = int_to_ptr.vmem [resolvable:$false] %s1719_s26 }
 0x8b7   : > { %1264 = vrot.lane.b32.xlu1 %v1254_v40, %s1797_s20  ;;  %s1721_s11 = scalar_lea.vmem %s1720_s26, 32  ;;  %p1722_p3 = scmp.lt.s32.totalorder %s2123_s18, %s1720_s26 }
 0x8b8   : > { %v487_v46 = vrot.slane %v486_v45, 1  ;;  %p1717_p1 = pnand %p1716_p0, %p1892_p5  ;;  %p1723_p4 = scmp.lt.s32.totalorder %s1721_s11, %s1715_s27 }
 0x8ba   : > { %v488_v48 = vadd.f32 %v487_v46, %v486_v45  ;;  %p1718_p2 = pneg %p1717_p1  ;;  %p1724_p7 = por %p1723_p4, %p1722_p3 }
 0x8bc   : > { %v1267_v50 = vsel %vm407_vm1, %v488_v48, %v1257_v47  ;;  %p1725_p8 = pnand %p1724_p7, %p1718_p2 }
 0x8bd   : > { %v1268_v51 = vsel %vm661_vm3, %v1267_v50, %v1261_v49 }
 0x929   : > { %v1265_v8 = vpop.permute.xlu1 %1264 }
 0x92a   : > { %v1270_v52 = vsel %vm1269_vm4, %v1268_v51, %v1265_v8 }
 0x92b   : > { %1272 = vst.msk [vmem:[%s387_s28] sm:$0x1] %vm1271_vm5, %v1270_v52 }
 0x92c   : > { %1728 = shalt.err (!%p1725_p8)
}
 0x92d   : > { %s1729_s29 = scalar_lea.hbm %s2121_s25, 16  ;;  %s1733_s28 = scalar_lea.hbm %s2174_s10, 64 }
 0x92e   : > { %p1730_p11 = scmp.ne.s32.totalorder %s2121_s25, %s1729_s29  ;;  %p1734_p12 = scmp.lt.u32.totalorder %s2121_s25, %s2174_s10 }
 0x92f   : > { %p1735_p13 = scmp.lt.u32.totalorder %s1733_s28, %s1729_s29  ;;  %p1737_p1 = scmp.lt.u32.totalorder %s1729_s29, %s2121_s25 }
 0x930   : > { %p1731_p9 = pnand %p1730_p11, %p1892_p5 }
 0x931   : > { %p1736_p0 = por %p1735_p13, %p1734_p12 }
 0x932   : > { %p1732_p10 = pneg %p1731_p9 }
 0x933   : > { %p1738_p2 = por %p1737_p1, %p1736_p0 }
 0x935   : > { %p1739_p3 = pnand %p1738_p2, %p1732_p10 }
 0x937   : > { %1742 = shalt.err (!%p1739_p3)
}
 0x938   : > { %1613 = dma.vmem_to_hbm [thread:$0]  (%p1892_p5), %s2123_s18, 16, %s2121_s25, %s1279_s17  }
 0x939 PF: > { %p1629_p4 = scmp.ge.s32.totalorder %s1785_s16, 2  ;;  %s1318_s27 = sand.u32 1, %s1773_s13  }
 0x93a   : > { %s1319_s21 = scalar_lea.sflag [#allocation3], %s1318_s27 }
 0x93b   : > { %p1621_p7 = pnand %p1629_p4, %p1896_p6 }
 0x93d   : > { %1764 = dma.done.wait (!%p1621_p7), %s1319_s21, 512  }
 0x93e   : > { %1766 = vsyncadd (!%p1621_p7), %s1319_s21, 4294966784  ;;  %s1328_s26 = scalar_lea.sflag [#allocation7], %s1318_s27 }
 0x93f   : > { %1768 = dma.done.wait (!%p1621_p7), %s1328_s26, 16  }
 0x940   : > { %1770 = vsyncadd (!%p1621_p7), %s1328_s26, 4294967280  ;;  %p25_p5 = scmp.ge.s32.totalorder %s1879_s19, 6   ;;  %s2181_s13 = smov %s1777_s14 }
 0x941   : > { %s2182_s14 = smov %s1781_s15  ;;  %s2183_s15 = smov %s1890_s22 }
 0x942   : > { %s2184_s16 = smov %s1879_s19  ;;  %27 = sbr.rel (!%p25_p5) target bundleno = 8 (0x8), region = 127 }
 0x949   :  { %1332 = vsyncpa [#allocation3], 1 }
 0x94a   :  { %1334 = vsyncpa [#allocation3 + $0x1], 1 }
 0x94b   :  { %1335 = vsyncpa [#allocation7], 1 }
 0x94c   :  { %1337 = vsyncpa [#allocation7 + $0x1], 1 }
 0x94d   :  { %1338 = vsyncpa [#allocation4], 1 }
 0x94e   :  { %1340 = vsyncpa [#allocation4 + $0x1], 1 }

</bundles_post_ra>
